<compile_context>
chip_gen: v7x
topology: tpu7x:2x2x1
jax: 0.10.0
libtpu: 0.0.40
codegen_flags: <defaults>
</compile_context>

<pallas_src>
import jax
import jax.numpy as jnp
from jax.experimental import pallas as pl
from jax.experimental.pallas import tpu as pltpu


def _round_up(x, m):
    return ((x + m - 1) // m) * m


def _cdiv(a, b):
    return (a + b - 1) // b


def _vmem_budget_bytes():
    """Generation-aware VMEM budget, leaving headroom for Mosaic internal
    scratch / semaphores (v5e/v6e: 128 MiB, v7x: 64 MiB per TensorCore)."""
    try:
        cap = int(pltpu.get_tpu_info().vmem_capacity_bytes)
    except Exception:
        cap = 64 << 20  # v7x per-TC VMEM; safe lower bound for every generation
    return max((cap * 3) // 4, 32 << 20)


# ----------------------------------------------------------------------------
# Kernels
# ----------------------------------------------------------------------------
def _linear_fullk_kernel(x_ref, w_ref, b_ref, o_ref):
    # Fast path: the whole K dimension is resident in VMEM -> single MXU pass
    # per (i, j) tile, no accumulator scratch, bias added once at writeback.
    # x is cast to the weight's (MXU compute) dtype in-kernel, so the wrapper
    # never materializes a casted copy of the activation in HBM.
    acc = jnp.dot(
        x_ref[...].astype(w_ref.dtype), w_ref[...],
        preferred_element_type=jnp.float32,
    )
    o_ref[...] = (acc + b_ref[...]).astype(o_ref.dtype)


def _linear_ktiled_kernel(x_ref, w_ref, b_ref, o_ref, acc_ref):
    # Fallback for very large K: classic 3-D grid with f32 accumulator scratch
    # resident across the (last, "arbitrary") K axis.
    k = pl.program_id(2)

    @pl.when(k == 0)
    def _init():
        # bias-initialize instead of zero-fill: finalize is then just cast+store
        acc_ref[...] = jnp.broadcast_to(b_ref[...], acc_ref.shape)

    acc_ref[...] += jnp.dot(
        x_ref[...].astype(w_ref.dtype), w_ref[...],
        preferred_element_type=jnp.float32,
    )

    @pl.when(k == pl.num_programs(2) - 1)
    def _finalize():
        o_ref[...] = acc_ref[...].astype(o_ref.dtype)


# ----------------------------------------------------------------------------
# Wrapper
# ----------------------------------------------------------------------------
def linear_forward(x, weight_t, bias2d, *, use_pallas=None,
                   tm_cap=512, tn_cap=1024, tk_cap=1024):
    """Forward of the BiDAF Linear wrapper (dropout=0.0 default -> plain affine).

    x:        [..., in_features]               (any float dtype; cast in-kernel)
    weight_t: [in_features, out_features]      (from prepare_params; compute dtype)
    bias2d:   [1, out_features] float32        (from prepare_params)
    """
    # TODO(synk): if dropout>0 were configured, apply an inverted-dropout mask
    # to x in plain JAX glue before the matmul (off by default in the module).
    *lead, k_dim = x.shape
    k_w, n_dim = weight_t.shape
    assert k_dim == k_w, (k_dim, k_w)
    m_dim = 1
    for d in lead:
        m_dim *= d
    out_dtype = x.dtype

    x2d = x.reshape(m_dim, k_dim)

    if use_pallas is None:
        # Tiny problems are dominated by launch / per-step overhead: let XLA fuse.
        use_pallas = (m_dim * n_dim * k_dim) >= (256 * 256 * 256)
    if not use_pallas:
        y = jnp.dot(x2d.astype(weight_t.dtype), weight_t,
                    preferred_element_type=jnp.float32) + bias2d
        return y.astype(out_dtype).reshape(*lead, n_dim)

    budget = _vmem_budget_bytes()
    x_isz = jnp.dtype(x.dtype).itemsize
    w_isz = jnp.dtype(weight_t.dtype).itemsize
    o_isz = jnp.dtype(out_dtype).itemsize

    cost = pl.CostEstimate(
        flops=2 * m_dim * n_dim * k_dim,
        transcendentals=0,
        bytes_accessed=(m_dim * k_dim * x_isz + k_dim * n_dim * w_isz
                        + m_dim * n_dim * o_isz + n_dim * 4),
    )

    # ---------------- fast path: full-K tiles, 2-D (M, N) grid ---------------
    tn = min(tn_cap, _round_up(n_dim, 128))   # whole N in one tile when small
    tm = min(tm_cap, _round_up(m_dim, 8))
    grid_m = _cdiv(m_dim, tm)
    grid_n = _cdiv(n_dim, tn)
    # v7x has 2 TensorCores fed by sharding the parallel grid axes: keep >= 2
    # output tiles when the problem is big enough to be worth splitting.
    if grid_m * grid_n == 1 and m_dim >= 128:
        tm = _round_up(_cdiv(m_dim, 2), 8)
        grid_m = _cdiv(m_dim, tm)

    fast_vmem = (2 * tm * k_dim * x_isz        # x tiles (double buffered)
                 + 2 * k_dim * tn * w_isz      # w tiles (double buffered)
                 + 2 * 8 * tn * 4              # (1, tn) f32 bias occupies 8 sublanes
                 + 2 * tm * tn * o_isz)        # out tiles (double buffered)

    if fast_vmem <= budget:
        out = pl.pallas_call(
            _linear_fullk_kernel,
            out_shape=jax.ShapeDtypeStruct((m_dim, n_dim), out_dtype),
            grid_spec=pltpu.PrefetchScalarGridSpec(
                num_scalar_prefetch=0,
                grid=(grid_m, grid_n),
                in_specs=[
                    pl.BlockSpec((tm, k_dim), lambda i, j: (i, 0)),
                    pl.BlockSpec((k_dim, tn), lambda i, j: (0, j)),
                    pl.BlockSpec((1, tn), lambda i, j: (0, j)),
                ],
                out_specs=pl.BlockSpec((tm, tn), lambda i, j: (i, j)),
            ),
            compiler_params=pltpu.CompilerParams(
                dimension_semantics=("parallel", "parallel"),
                vmem_limit_bytes=int(budget),
            ),
            cost_estimate=cost,
        )(x2d, weight_t, bias2d)
        return out.reshape(*lead, n_dim)

    # --------------- fallback: K too large for a full-K VMEM tile ------------
    tm = min(512, _round_up(m_dim, 8))
    tn = min(512, _round_up(n_dim, 128))
    tk = min(tk_cap, _round_up(k_dim, 128))
    mp = _round_up(m_dim, tm)
    np_ = _round_up(n_dim, tn)
    kp = _round_up(k_dim, tk)
    # K (reduction) axis must be exactly padded for accumulator correctness.
    xp = x2d
    if (mp, kp) != (m_dim, k_dim):
        xp = jnp.pad(x2d, ((0, mp - m_dim), (0, kp - k_dim)))
    wp = weight_t
    if (kp, np_) != (k_dim, n_dim):
        wp = jnp.pad(weight_t, ((0, kp - k_dim), (0, np_ - n_dim)))
    bp = bias2d
    if np_ != n_dim:
        bp = jnp.pad(bias2d, ((0, 0), (0, np_ - n_dim)))

    out = pl.pallas_call(
        _linear_ktiled_kernel,
        out_shape=jax.ShapeDtypeStruct((mp, np_), out_dtype),
        grid_spec=pltpu.PrefetchScalarGridSpec(
            num_scalar_prefetch=0,
            grid=(mp // tm, np_ // tn, kp // tk),
            in_specs=[
                pl.BlockSpec((tm, tk), lambda i, j, k: (i, k)),
                pl.BlockSpec((tk, tn), lambda i, j, k: (k, j)),
                pl.BlockSpec((1, tn), lambda i, j, k: (0, j)),
            ],
            out_specs=pl.BlockSpec((tm, tn), lambda i, j, k: (i, j)),
            scratch_shapes=[pltpu.VMEM((tm, tn), jnp.float32)],
        ),
        compiler_params=pltpu.CompilerParams(
            dimension_semantics=("parallel", "parallel", "arbitrary"),
            vmem_limit_bytes=int(budget),
        ),
        cost_estimate=cost,
    )(xp, wp, bp)
    if (mp, np_) != (m_dim, n_dim):
        out = out[:m_dim, :n_dim]
    return out.reshape(*lead, n_dim)


# ----------------------------------------------------------------------------
# Parameter helpers (mirror the PyTorch module)
# ----------------------------------------------------------------------------
def init_params(key, in_features, out_features, dtype=jnp.float32):
    # Mirrors reset_params():
    #   nn.init.kaiming_normal_(weight) -> N(0, sqrt(2/fan_in)), fan_in = in_features
    #   nn.init.constant_(bias, 0)
    std = (2.0 / in_features) ** 0.5
    weight = std * jax.random.normal(key, (out_features, in_features), dtype=dtype)
    bias = jnp.zeros((out_features,), dtype=dtype)
    return weight, bias


def prepare_params(weight, bias, compute_dtype=jnp.bfloat16):
    """One-time prep, OFF the hot path: transpose (out,in)->(in,out), cast the
    weight to the MXU compute dtype (default bf16; pass jnp.float32 to keep
    full precision), and reshape the bias to a (1, out) f32 row."""
    weight_t = jnp.asarray(weight).T.astype(compute_dtype)
    bias2d = jnp.asarray(bias).astype(jnp.float32).reshape(1, -1)
    return weight_t, bias2d


if __name__ == "__main__":
    key = jax.random.PRNGKey(0)
    kx, kw, kx2, kw2 = jax.random.split(key, 4)

    # --- Case 1: small shapes consistent with the module's usage ------------
    # f32 escape hatch (exact path), forces the Pallas full-K fast path.
    batch, seq, in_features, out_features = 2, 8, 32, 64
    x = jax.random.normal(kx, (batch, seq, in_features), dtype=jnp.float32)
    weight, bias = init_params(kw, in_features, out_features)
    w_t, b2d = prepare_params(weight, bias, compute_dtype=jnp.float32)

    y = linear_forward(x, w_t, b2d, use_pallas=True)
    y = jax.block_until_ready(y)
    y_ref = x @ weight.T + bias
    assert y.shape == (batch, seq, out_features)
    assert jnp.allclose(y, y_ref, atol=2e-2, rtol=2e-2), float(
        jnp.max(jnp.abs(y - y_ref))
    )

    # --- Case 2: larger problem, default bf16 MXU inputs, >=2 parallel tiles
    b2, s2, in2, out2 = 2, 96, 1024, 384
    x2 = jax.random.normal(kx2, (b2, s2, in2), dtype=jnp.float32)
    w2, bias2 = init_params(kw2, in2, out2)
    w2_t, b2_2d = prepare_params(w2, bias2)  # bf16 weights, f32 accumulation

    y2 = linear_forward(x2, w2_t, b2_2d, use_pallas=True)
    y2 = jax.block_until_ready(y2)
    y2_ref = x2 @ w2.T + bias2
    assert y2.shape == (b2, s2, out2)
    assert jnp.allclose(y2, y2_ref, atol=5e-2, rtol=5e-2), float(
        jnp.max(jnp.abs(y2 - y2_ref))
    )

    print("KERNEL_OK")
</pallas_src>

<mosaic_0001>
module attributes {stable_mosaic.version = 11 : i64} {
  func.func @_linear_fullk_kernel(%arg0: i32, %arg1: i32, %arg2: memref<16x32xf32, #tpu.memory_space<vmem>>, %arg3: memref<32x128xf32, #tpu.memory_space<vmem>>, %arg4: memref<1x128xf32, #tpu.memory_space<vmem>>, %arg5: memref<16x128xf32, #tpu.memory_space<vmem>>) attributes {dimension_semantics = [#tpu.dimension_semantics<parallel>, #tpu.dimension_semantics<parallel>], iteration_bounds = array<i64: 1, 1>, scalar_prefetch = 0 : i64, scratch_operands = 0 : i64, tpu.core_type = #tpu.core_type<tc>, window_params = [{transform_indices = @transform_0, window_bounds = array<i64: 16, 32>}, {transform_indices = @transform_1, window_bounds = array<i64: 32, 128>}, {transform_indices = @transform_2, window_bounds = array<i64: 1, 128>}, {transform_indices = @transform_3, window_bounds = array<i64: 16, 128>}]} {
    %c0 = arith.constant 0 : index
    %c0_0 = arith.constant 0 : index
    %0 = vector.load %arg2[%c0, %c0_0] : memref<16x32xf32, #tpu.memory_space<vmem>>, vector<16x32xf32>
    %c0_1 = arith.constant 0 : index
    %c0_2 = arith.constant 0 : index
    %1 = vector.load %arg3[%c0_1, %c0_2] : memref<32x128xf32, #tpu.memory_space<vmem>>, vector<32x128xf32>
    %cst = arith.constant dense<0.000000e+00> : vector<16x128xf32>
    %2 = tpu.matmul %0, %1, %cst {dimension_numbers = #tpu.dot_dimension_numbers<[1], [0], [0], [1], [0, 0, 1, 1], [], []>} : vector<16x32xf32>, vector<32x128xf32>, vector<16x128xf32> -> vector<16x128xf32>
    %c0_3 = arith.constant 0 : index
    %c0_4 = arith.constant 0 : index
    %3 = vector.load %arg4[%c0_3, %c0_4] : memref<1x128xf32, #tpu.memory_space<vmem>>, vector<1x128xf32>
    %4 = vector.broadcast %3 : vector<1x128xf32> to vector<16x128xf32>
    %5 = arith.addf %2, %4 : vector<16x128xf32>
    %c0_5 = arith.constant 0 : index
    %c0_6 = arith.constant 0 : index
    %6 = vector.load %arg5[%c0_5, %c0_6] : memref<16x128xf32, #tpu.memory_space<vmem>>, vector<16x128xf32>
    tpu.vector_store %arg5[%c0_5, %c0_6], %5 {strides = array<i32>} : memref<16x128xf32, #tpu.memory_space<vmem>>, vector<16x128xf32>,
    return
  }
  func.func @transform_0(%arg0: i32, %arg1: i32) -> (i32, i32) {
    %c0_i32 = arith.constant 0 : i32
    %c0_i32_0 = arith.constant 0 : i32
    return %arg0, %c0_i32 : i32, i32
  }
  func.func @transform_1(%arg0: i32, %arg1: i32) -> (i32, i32) {
    %c0_i32 = arith.constant 0 : i32
    %c0_i32_0 = arith.constant 0 : i32
    return %c0_i32, %arg1 : i32, i32
  }
  func.func @transform_2(%arg0: i32, %arg1: i32) -> (i32, i32) {
    %c0_i32 = arith.constant 0 : i32
    %c0_i32_0 = arith.constant 0 : i32
    return %c0_i32, %arg1 : i32, i32
  }
  func.func @transform_3(%arg0: i32, %arg1: i32) -> (i32, i32) {
    %c0_i32 = arith.constant 0 : i32
    return %arg0, %arg1 : i32, i32
  }
}

</mosaic_0001>

<bundles_post_ra>
// kernel: tpu_custom_call.1
= control target key start
LH: loop header
LB: loop body
LE: loop exit
PB: predicated region body
PF: predicated region fallthrough
CT: control target
= control target key end

     0   :  { %8 = vsyncpa [#allocation3], 0  ;;  %s336_s0 = inlined_call_operand.hbm [shape: f32[16,32], index: 0, kind: input, shape index: {}]   ;;  %s337_s1 = inlined_call_operand.hbm [shape: f32[32,64], index: 1, kind: input, shape index: {}]   ;;  %s338_s2 = inlined_call_operand.vmem [shape: f32[1,64], index: 2, kind: input, shape index: {}]   ;;  %s339_s3 = inlined_call_operand.hbm [shape: f32[16,64], index: 3, kind: output, shape index: {}]  }
   0x1   :  { %9 = vsyncpa [#allocation6], 0 }
   0x2   :  { %10 = vsyncpa [#allocation4], 0  ;;  %s263_s12 = smov [#allocation2]   ;;  %s191_s16 = scalar_lea.hbm %s336_s0, 256 }
   0x3   :  { %s16_s13 = sshll.u32 %s263_s12, 4  ;;  %p192_p0 = scmp.ne.s32.totalorder %s336_s0, %s191_s16  ;;  %s17_s13 = int_to_ptr.vmem [resolvable:$true] %s16_s13 }
   0x4   :  { %p195_p1 = scmp.lt.u32.totalorder %s191_s16, %s336_s0 }
   0x6   :  { %p197_p2 = pnand %p195_p1, %p192_p0 }
   0x8   :  { %200 = shalt.err (!%p197_p2)
}
   0x9   :  { %s201_s21 = scalar_lea.vmem %s17_s13, 256  ;;  %p206_p4 = scmp.lt.s32.totalorder %s17_s13, %s17_s13 }
   0xa   :  { %p202_p3 = scmp.ne.s32.totalorder %s17_s13, %s201_s21  ;;  %p207_p5 = scmp.lt.s32.totalorder %s201_s21, %s201_s21 }
   0xc   :  { %p208_p6 = por %p207_p5, %p206_p4 }
   0xe   :  { %p209_p7 = pnand %p208_p6, %p202_p3 }
  0x10   :  { %212 = shalt.err (!%p209_p7)
}
  0x11   :  { %s264_s22 = smov 128   ;;  %s265_s23 = smov 8  }
  0x12   :  { %22 = dma.hbm_to_vmem [thread:$0]  %s336_s0, 256, %s17_s13, [#allocation3], %s264_s22, %s264_s22, %s265_s23  }
  0x13   :  { %s266_s26 = smov [#allocation5]   ;;  %s213_s30 = scalar_lea.hbm %s337_s1, 512 }
  0x14   :  { %s28_s27 = sshll.u32 %s266_s26, 4  ;;  %p214_p8 = scmp.ne.s32.totalorder %s337_s1, %s213_s30  ;;  %s29_s27 = int_to_ptr.vmem [resolvable:$true] %s28_s27 }
  0x15   :  { %p217_p9 = scmp.lt.u32.totalorder %s213_s30, %s337_s1 }
  0x17   :  { %p219_p10 = pnand %p217_p9, %p214_p8 }
  0x19   :  { %222 = shalt.err (!%p219_p10)
}
  0x1a   :  { %s223_s8 = scalar_lea.vmem %s29_s27, 512  ;;  %p228_p12 = scmp.lt.s32.totalorder %s29_s27, %s29_s27 }
  0x1b   :  { %p224_p11 = scmp.ne.s32.totalorder %s29_s27, %s223_s8  ;;  %p229_p13 = scmp.lt.s32.totalorder %s223_s8, %s223_s8 }
  0x1d   :  { %p230_p0 = por %p229_p13, %p228_p12 }
  0x1f   :  { %p231_p1 = pnand %p230_p0, %p224_p11 }
  0x21   :  { %234 = shalt.err (!%p231_p1)
}
  0x22   :  { %34 = dma.hbm_to_vmem [thread:$0]  %s337_s1, 512, %s29_s27, [#allocation6], %s264_s22, %s264_s22, %s265_s23  }
  0x23   :  { %257 = dma.done.wait [#allocation3], 256  }
  0x24   :  { %258 = vsyncadd [#allocation3], 4294967040 }
  0x25   :  { %259 = dma.done.wait [#allocation6], 512  }
  0x26   :  { %260 = vsyncadd [#allocation6], 4294966784  ;;  %vm56_vm0 = vcmask 261120   ;;  %v45_v0 = vld [vmem:[#allocation5] sm:$0xff]  ;;  %v46_v1 = vld [vmem:[#allocation5 + $0x8] sm:$0xff]  ;;  %s267_s11 = smov [#allocation7]  }
  0x27   :  { %v47_v2 = vld [vmem:[#allocation5 + $0x10] sm:$0xff]  ;;  %v178_v3 = vpack.c.bf16 %v46_v1, %v45_v0  ;;  %v48_v4 = vld [vmem:[#allocation5 + $0x18] sm:$0xff]  ;;  %s145_s12 = sshll.u32 %s267_s11, 4  ;;  %s146_s12 = int_to_ptr.vmem [resolvable:$true] %s145_s12 }
  0x28   :  { %v43_v5 = vld [vmem:[#allocation2] sm:$0xff]  ;;  %v182_v6 = vpack.c.bf16 %v48_v4, %v47_v2  ;;  %v44_v7 = vld [vmem:[#allocation2 + $0x8] sm:$0xff]  ;;  %s235_s13 = scalar_lea.vmem %s146_s12, 256  ;;  %p240_p3 = scmp.lt.s32.totalorder %s146_s12, %s146_s12 }
  0x29   :  { %175 = vmatprep.mubr.msk.f32.mxu0 %vm56_vm0, %v43_v5  ;;  %179 = vmatprep.subr.bf16.mxu0 %v178_v3  ;;  %v158_v8 = vld [vmem:[%s338_s2] ss:$0 sm:$0xff]  ;;  %p236_p2 = scmp.ne.s32.totalorder %s146_s12, %s235_s13  ;;  %p241_p4 = scmp.lt.s32.totalorder %s235_s13, %s235_s13 }
  0x2a   :  { %181 = vmatpush3.bf16.msra.mxu0 %v178_v3 }
  0x2b   :  { %183 = vmatprep.subr.bf16.mxu0 %v182_v6  ;;  %p242_p5 = por %p241_p4, %p240_p3 }
  0x2d   :  { %p243_p6 = pnand %p242_p5, %p236_p2 }
  0x2e   :  { %185 = vmatpush3.bf16.msra.mxu0 %v182_v6 }
  0x31   :  { %176 = vmatmul.mubr.msk.f32.vlgmr.msra.gmra.mrb[0].mxu0 %vm56_vm0, %v44_v7 }
 0x104   :  { %v177_v9 = vpop.f32.mrb[0].mxu0 }
 0x105   :  { %v135_v10 = vadd.f32 %v177_v9, %v158_v8  ;;  %v129_v11 = vpop.f32.mrb[1].mxu0 }
 0x106   :  { %v130_v12 = vadd.f32 %v158_v8, %v129_v11 }
 0x107   :  { %139 = vst [vmem:[#allocation7 + $0x8] sm:$0xff] %v135_v10 }
 0x108   :  { %138 = vst [vmem:[#allocation7] sm:$0xff] %v130_v12 }
 0x109   :  { %246 = shalt.err (!%p243_p6)
}
 0x10a   :  { %s247_s2 = scalar_lea.hbm %s339_s3, 256 }
 0x10b   :  { %p248_p7 = scmp.ne.s32.totalorder %s339_s3, %s247_s2  ;;  %p251_p8 = scmp.lt.u32.totalorder %s247_s2, %s339_s3 }
 0x10d   :  { %p253_p9 = pnand %p251_p8, %p248_p7 }
 0x10f   :  { %256 = shalt.err (!%p253_p9)
}
 0x110   :  { %151 = dma.vmem_to_hbm [thread:$0]  %s146_s12, 256, %s339_s3, [#allocation4], %s264_s22, %s264_s22, %s265_s23  }
 0x111   :  { %261 = dma.done.wait [#allocation4], 256  }
 0x112   :  { %262 = vsyncadd [#allocation4], 4294967040 }
 0x113   :  { %155 = vsyncpa [#allocation3], 1 }
 0x114   :  { %156 = vsyncpa [#allocation6], 1 }
 0x115   :  { %157 = vsyncpa [#allocation4], 1 }

</bundles_post_ra>
